<compile_context>
chip_gen: v6e
topology: v6e:2x2x1
jax: 0.10.0
libtpu: 0.0.40
codegen_flags: <defaults>
</compile_context>

<pallas_src>
import functools

import jax
import jax.numpy as jnp
from jax.experimental import pallas as pl
from jax.experimental.pallas import tpu as pltpu

BN_EPS = 1e-5
LANE = 128


def _round_up(n, m):
    return ((n + m - 1) // m) * m


# ----------------------------- Pallas kernel ---------------------------------
def _fused_mlp_kernel(*refs, relu_flags):
    """Whole forward pass in one kernel.

    refs = (x_ref, w_0, s_0, w_1, s_1, ..., w_{L-1}, s_{L-1}, o_ref).
    Layer l computes y = h @ w_l + s_l (bias + eval-BN already folded into
    w_l / s_l), optional ReLU.  Activations stay in vregs/VMEM between layers.
    bf16 MXU matmuls with f32 accumulation; f32 epilogue.
    """
    n_layers = len(relu_flags)
    x_ref = refs[0]
    o_ref = refs[-1]
    h = x_ref[...]                                  # bf16 activations
    for l in range(n_layers):
        w = refs[1 + 2 * l][...]                    # bf16 [in, out_pad]
        s = refs[2 + 2 * l][...]                    # f32  [1, out_pad]
        y = jnp.dot(h, w, preferred_element_type=jnp.float32) + s
        if relu_flags[l]:
            y = jnp.maximum(y, 0.0)
        h = y.astype(jnp.bfloat16) if l + 1 < n_layers else y
    o_ref[...] = h.astype(o_ref.dtype)


def fused_forward(fused_layers, x, n_tasks, *, max_batch_tile=256):
    """Run the whole multi-task forward as one pallas_call.

    fused_layers: list of (W bf16 [in, out_pad], shift f32 [1, out_pad], relu).
    Returns a list of n_tasks arrays of shape [B, 1] (float32).
    """
    B = x.shape[0]
    x = x.reshape(B, -1)

    tb = max_batch_tile if B >= max_batch_tile else _round_up(B, 8)
    B_pad = _round_up(B, tb)
    x_p = jnp.pad(x, ((0, B_pad - B), (0, 0))).astype(jnp.bfloat16)

    relu_flags = tuple(r for (_, _, r) in fused_layers)
    out_pad = fused_layers[-1][0].shape[1]

    in_specs = [pl.BlockSpec((tb, x_p.shape[1]), lambda i: (i, 0))]
    operands = [x_p]
    for (W, S, _) in fused_layers:
        in_specs.append(pl.BlockSpec(W.shape, lambda i: (0, 0)))   # resident
        in_specs.append(pl.BlockSpec(S.shape, lambda i: (0, 0)))   # resident
        operands.extend([W, S])

    out = pl.pallas_call(
        functools.partial(_fused_mlp_kernel, relu_flags=relu_flags),
        out_shape=jax.ShapeDtypeStruct((B_pad, out_pad), jnp.float32),
        grid=(B_pad // tb,),
        in_specs=in_specs,
        out_specs=pl.BlockSpec((tb, out_pad), lambda i: (i, 0)),
        compiler_params=pltpu.CompilerParams(
            dimension_semantics=("parallel",)),   # shards across TCs on v7x
    )(*operands)

    out = out[:B, :n_tasks]
    return [out[:, t:t + 1] for t in range(n_tasks)]


# --------------------------- parameter construction ---------------------------
def _make_linear(key, fan_in, fan_out):
    """Deterministic Linear params (PyTorch-like uniform init)."""
    kw, kb = jax.random.split(key)
    bound = 1.0 / float(fan_in) ** 0.5
    w = jax.random.uniform(kw, (fan_in, fan_out), jnp.float32, -bound, bound)
    b = jax.random.uniform(kb, (fan_out,), jnp.float32, -bound, bound)
    return w, b


def _make_bn(key, size):
    """Deterministic (non-trivial) eval-mode BatchNorm1d parameters."""
    kg, kb, km, kv = jax.random.split(key, 4)
    return dict(
        gamma=1.0 + 0.1 * jax.random.normal(kg, (size,), jnp.float32),
        beta=0.1 * jax.random.normal(kb, (size,), jnp.float32),
        mean=0.05 * jax.random.normal(km, (size,), jnp.float32),
        var=1.0 + 0.1 * jax.random.uniform(kv, (size,), jnp.float32),
    )


def init_params(key, n_features, layer_sizes, hidden_layer_sizes, n_tasks):
    params = {"shared": [], "tasks": []}
    prev = n_features
    for size in layer_sizes:
        key, k1, k2 = jax.random.split(key, 3)
        w, b = _make_linear(k1, prev, size)
        params["shared"].append(dict(w=w, b=b, **_make_bn(k2, size)))
        prev = size
    final_shared = prev
    for _ in range(n_tasks):
        task = {"blocks": []}
        tsize = final_shared
        for size in hidden_layer_sizes:
            key, k1, k2 = jax.random.split(key, 3)
            w, b = _make_linear(k1, tsize, size)
            task["blocks"].append(dict(w=w, b=b, **_make_bn(k2, size)))
            tsize = size
        key, k1 = jax.random.split(key)
        hw, hb = _make_linear(k1, tsize, 1)
        task["head"] = dict(w=hw, b=hb)
        params["tasks"].append(task)
    return params


# --------------------------- weight folding / fusion ---------------------------
def _fold_linear_bn(w, b, gamma, beta, mean, var):
    """Fold Linear bias + eval-mode BatchNorm into (W', shift')."""
    scale = gamma / jnp.sqrt(var + BN_EPS)
    return w * scale[None, :], ((b - mean) * scale + beta)[None, :]


def _block_diag(mats):
    rows = sum(m.shape[0] for m in mats)
    cols = sum(m.shape[1] for m in mats)
    out = jnp.zeros((rows, cols), jnp.float32)
    r = c = 0
    for m in mats:
        out = out.at[r:r + m.shape[0], c:c + m.shape[1]].set(m)
        r += m.shape[0]
        c += m.shape[1]
    return out


def prepare_fused_layers(params):
    """Build the fused layer list: fold bias+BN into weights, merge all task
    branches into concatenated / block-diagonal matmuls, pad output widths to
    multiples of 128 lanes, cast weights to bf16 (shifts stay f32)."""
    layers = []  # (W f32 [in, out], shift f32 [1, out], relu)
    for lyr in params["shared"]:
        w, s = _fold_linear_bn(**lyr)
        layers.append((w, s, True))

    n_hidden = len(params["tasks"][0]["blocks"])
    # Task hidden layers: layer 0 reads the same trunk output for every task ->
    # concatenate along the output dim; deeper layers are block-diagonal.
    for k in range(n_hidden):
        ws, ss = [], []
        for task in params["tasks"]:
            w, s = _fold_linear_bn(**task["blocks"][k])
            ws.append(w)
            ss.append(s)
        W = jnp.concatenate(ws, axis=1) if k == 0 else _block_diag(ws)
        layers.append((W, jnp.concatenate(ss, axis=1), True))

    # Heads: single [sum(tsize), n_tasks] matmul instead of n_tasks lane-1 ones.
    hws = [t["head"]["w"] for t in params["tasks"]]
    hbs = [t["head"]["b"][None, :] for t in params["tasks"]]
    W = jnp.concatenate(hws, axis=1) if n_hidden == 0 else _block_diag(hws)
    layers.append((W, jnp.concatenate(hbs, axis=1), False))

    # Pad to lane-dense widths (zero padding keeps the math exact: relu(0)=0
    # and zero weight rows/cols contribute nothing downstream).
    padded = []
    in_dim = layers[0][0].shape[0]          # = n_features (input not padded)
    for (W, S, relu) in layers:
        out_pad = _round_up(W.shape[1], LANE)
        Wp = jnp.pad(W, ((0, in_dim - W.shape[0]), (0, out_pad - W.shape[1])))
        Sp = jnp.pad(S, ((0, 0), (0, out_pad - S.shape[1])))
        padded.append((Wp.astype(jnp.bfloat16), Sp, relu))
        in_dim = out_pad
    return padded


# -------------------------------- reference ------------------------------------
def forward_ref(params, x):
    """Pure-JAX f32 reference with the original module's eval-mode semantics."""
    x = x.reshape(x.shape[0], -1)
    for lyr in params["shared"]:
        y = x @ lyr["w"] + lyr["b"]
        y = (y - lyr["mean"]) / jnp.sqrt(lyr["var"] + BN_EPS) * lyr["gamma"] + lyr["beta"]
        x = jnp.maximum(y, 0.0)
    outs = []
    for task in params["tasks"]:
        h = x
        for blk in task["blocks"]:
            y = h @ blk["w"] + blk["b"]
            y = (y - blk["mean"]) / jnp.sqrt(blk["var"] + BN_EPS) * blk["gamma"] + blk["beta"]
            h = jnp.maximum(y, 0.0)
        outs.append(h @ task["head"]["w"] + task["head"]["b"][None, :])
    return outs


# --------------------------------- main ---------------------------------------
if __name__ == "__main__":
    # Small shapes consistent with the module's forward.
    batch = 8
    n_features = 32
    layer_sizes = [64, 32]
    hidden_layer_sizes = [32]
    n_tasks = 3

    key = jax.random.PRNGKey(0)
    kx, kp = jax.random.split(key)
    x = jax.random.normal(kx, (batch, n_features), jnp.float32)
    params = init_params(kp, n_features, layer_sizes, hidden_layer_sizes, n_tasks)

    fused_layers = prepare_fused_layers(params)
    outs = fused_forward(fused_layers, x, n_tasks)
    outs = [jax.block_until_ready(o) for o in outs]

    refs = forward_ref(params, x)
    for o, r in zip(outs, refs):
        assert o.shape == (batch, 1)
        # bf16 MXU operands with f32 accumulation -> loosened tolerance.
        assert jnp.allclose(o, r, atol=5e-2, rtol=5e-2)

    print("KERNEL_OK")
</pallas_src>

<mosaic_0001>
module attributes {stable_mosaic.version = 11 : i64} {
  func.func @_fused_mlp_kernel(%arg0: i32, %arg1: memref<8x32xbf16, #tpu.memory_space<vmem>>, %arg2: memref<32x128xbf16, #tpu.memory_space<vmem>>, %arg3: memref<1x128xf32, #tpu.memory_space<vmem>>, %arg4: memref<128x128xbf16, #tpu.memory_space<vmem>>, %arg5: memref<1x128xf32, #tpu.memory_space<vmem>>, %arg6: memref<128x128xbf16, #tpu.memory_space<vmem>>, %arg7: memref<1x128xf32, #tpu.memory_space<vmem>>, %arg8: memref<128x128xbf16, #tpu.memory_space<vmem>>, %arg9: memref<1x128xf32, #tpu.memory_space<vmem>>, %arg10: memref<8x128xf32, #tpu.memory_space<vmem>>) attributes {dimension_semantics = [#tpu.dimension_semantics<parallel>], iteration_bounds = array<i64: 1>, scalar_prefetch = 0 : i64, scratch_operands = 0 : i64, tpu.core_type = #tpu.core_type<tc>, window_params = [{transform_indices = @transform_0, window_bounds = array<i64: 8, 32>}, {pipeline_mode = #tpu.pipeline_mode<synchronous>, transform_indices = @transform_1, window_bounds = array<i64: 32, 128>}, {pipeline_mode = #tpu.pipeline_mode<synchronous>, transform_indices = @transform_2, window_bounds = array<i64: 1, 128>}, {pipeline_mode = #tpu.pipeline_mode<synchronous>, transform_indices = @transform_3, window_bounds = array<i64: 128, 128>}, {pipeline_mode = #tpu.pipeline_mode<synchronous>, transform_indices = @transform_4, window_bounds = array<i64: 1, 128>}, {pipeline_mode = #tpu.pipeline_mode<synchronous>, transform_indices = @transform_5, window_bounds = array<i64: 128, 128>}, {pipeline_mode = #tpu.pipeline_mode<synchronous>, transform_indices = @transform_6, window_bounds = array<i64: 1, 128>}, {pipeline_mode = #tpu.pipeline_mode<synchronous>, transform_indices = @transform_7, window_bounds = array<i64: 128, 128>}, {pipeline_mode = #tpu.pipeline_mode<synchronous>, transform_indices = @transform_8, window_bounds = array<i64: 1, 128>}, {transform_indices = @transform_9, window_bounds = array<i64: 8, 128>}]} {
    %c0 = arith.constant 0 : index
    %c0_0 = arith.constant 0 : index
    %0 = vector.load %arg1[%c0, %c0_0] : memref<8x32xbf16, #tpu.memory_space<vmem>>, vector<8x32xbf16>
    %c0_1 = arith.constant 0 : index
    %c0_2 = arith.constant 0 : index
    %1 = vector.load %arg2[%c0_1, %c0_2] : memref<32x128xbf16, #tpu.memory_space<vmem>>, vector<32x128xbf16>
    %c0_3 = arith.constant 0 : index
    %c0_4 = arith.constant 0 : index
    %2 = vector.load %arg3[%c0_3, %c0_4] : memref<1x128xf32, #tpu.memory_space<vmem>>, vector<1x128xf32>
    %cst = arith.constant dense<0.000000e+00> : vector<8x128xf32>
    %3 = tpu.matmul %0, %1, %cst {dimension_numbers = #tpu.dot_dimension_numbers<[1], [0], [0], [1], [0, 0, 1, 1], [], []>} : vector<8x32xbf16>, vector<32x128xbf16>, vector<8x128xf32> -> vector<8x128xf32>
    %4 = vector.broadcast %2 : vector<1x128xf32> to vector<8x128xf32>
    %5 = arith.addf %3, %4 : vector<8x128xf32>
    %cst_5 = arith.constant 0.000000e+00 : f32
    %6 = vector.broadcast %cst_5 : f32 to vector<8x128xf32>
    %7 = arith.maximumf %5, %6 : vector<8x128xf32>
    %8 = arith.truncf %7 : vector<8x128xf32> to vector<8x128xbf16>
    %c0_6 = arith.constant 0 : index
    %c0_7 = arith.constant 0 : index
    %9 = vector.load %arg4[%c0_6, %c0_7] : memref<128x128xbf16, #tpu.memory_space<vmem>>, vector<128x128xbf16>
    %c0_8 = arith.constant 0 : index
    %c0_9 = arith.constant 0 : index
    %10 = vector.load %arg5[%c0_8, %c0_9] : memref<1x128xf32, #tpu.memory_space<vmem>>, vector<1x128xf32>
    %cst_10 = arith.constant dense<0.000000e+00> : vector<8x128xf32>
    %11 = tpu.matmul %8, %9, %cst_10 {dimension_numbers = #tpu.dot_dimension_numbers<[1], [0], [0], [1], [0, 0, 1, 1], [], []>} : vector<8x128xbf16>, vector<128x128xbf16>, vector<8x128xf32> -> vector<8x128xf32>
    %12 = vector.broadcast %10 : vector<1x128xf32> to vector<8x128xf32>
    %13 = arith.addf %11, %12 : vector<8x128xf32>
    %cst_11 = arith.constant 0.000000e+00 : f32
    %14 = vector.broadcast %cst_11 : f32 to vector<8x128xf32>
    %15 = arith.maximumf %13, %14 : vector<8x128xf32>
    %16 = arith.truncf %15 : vector<8x128xf32> to vector<8x128xbf16>
    %c0_12 = arith.constant 0 : index
    %c0_13 = arith.constant 0 : index
    %17 = vector.load %arg6[%c0_12, %c0_13] : memref<128x128xbf16, #tpu.memory_space<vmem>>, vector<128x128xbf16>
    %c0_14 = arith.constant 0 : index
    %c0_15 = arith.constant 0 : index
    %18 = vector.load %arg7[%c0_14, %c0_15] : memref<1x128xf32, #tpu.memory_space<vmem>>, vector<1x128xf32>
    %cst_16 = arith.constant dense<0.000000e+00> : vector<8x128xf32>
    %19 = tpu.matmul %16, %17, %cst_16 {dimension_numbers = #tpu.dot_dimension_numbers<[1], [0], [0], [1], [0, 0, 1, 1], [], []>} : vector<8x128xbf16>, vector<128x128xbf16>, vector<8x128xf32> -> vector<8x128xf32>
    %20 = vector.broadcast %18 : vector<1x128xf32> to vector<8x128xf32>
    %21 = arith.addf %19, %20 : vector<8x128xf32>
    %cst_17 = arith.constant 0.000000e+00 : f32
    %22 = vector.broadcast %cst_17 : f32 to vector<8x128xf32>
    %23 = arith.maximumf %21, %22 : vector<8x128xf32>
    %24 = arith.truncf %23 : vector<8x128xf32> to vector<8x128xbf16>
    %c0_18 = arith.constant 0 : index
    %c0_19 = arith.constant 0 : index
    %25 = vector.load %arg8[%c0_18, %c0_19] : memref<128x128xbf16, #tpu.memory_space<vmem>>, vector<128x128xbf16>
    %c0_20 = arith.constant 0 : index
    %c0_21 = arith.constant 0 : index
    %26 = vector.load %arg9[%c0_20, %c0_21] : memref<1x128xf32, #tpu.memory_space<vmem>>, vector<1x128xf32>
    %cst_22 = arith.constant dense<0.000000e+00> : vector<8x128xf32>
    %27 = tpu.matmul %24, %25, %cst_22 {dimension_numbers = #tpu.dot_dimension_numbers<[1], [0], [0], [1], [0, 0, 1, 1], [], []>} : vector<8x128xbf16>, vector<128x128xbf16>, vector<8x128xf32> -> vector<8x128xf32>
    %28 = vector.broadcast %26 : vector<1x128xf32> to vector<8x128xf32>
    %29 = arith.addf %27, %28 : vector<8x128xf32>
    %c0_23 = arith.constant 0 : index
    %c0_24 = arith.constant 0 : index
    %30 = vector.load %arg10[%c0_23, %c0_24] : memref<8x128xf32, #tpu.memory_space<vmem>>, vector<8x128xf32>
    tpu.vector_store %arg10[%c0_23, %c0_24], %29 {strides = array<i32>} : memref<8x128xf32, #tpu.memory_space<vmem>>, vector<8x128xf32>,
    return
  }
  func.func @transform_0(%arg0: i32) -> (i32, i32) {
    %c0_i32 = arith.constant 0 : i32
    %c0_i32_0 = arith.constant 0 : i32
    return %arg0, %c0_i32 : i32, i32
  }
  func.func @transform_1(%arg0: i32) -> (i32, i32) {
    %c0_i32 = arith.constant 0 : i32
    %c0_i32_0 = arith.constant 0 : i32
    %c0_i32_1 = arith.constant 0 : i32
    return %c0_i32, %c0_i32_0 : i32, i32
  }
  func.func @transform_2(%arg0: i32) -> (i32, i32) {
    %c0_i32 = arith.constant 0 : i32
    %c0_i32_0 = arith.constant 0 : i32
    %c0_i32_1 = arith.constant 0 : i32
    return %c0_i32, %c0_i32_0 : i32, i32
  }
  func.func @transform_3(%arg0: i32) -> (i32, i32) {
    %c0_i32 = arith.constant 0 : i32
    %c0_i32_0 = arith.constant 0 : i32
    %c0_i32_1 = arith.constant 0 : i32
    return %c0_i32, %c0_i32_0 : i32, i32
  }
  func.func @transform_4(%arg0: i32) -> (i32, i32) {
    %c0_i32 = arith.constant 0 : i32
    %c0_i32_0 = arith.constant 0 : i32
    %c0_i32_1 = arith.constant 0 : i32
    return %c0_i32, %c0_i32_0 : i32, i32
  }
  func.func @transform_5(%arg0: i32) -> (i32, i32) {
    %c0_i32 = arith.constant 0 : i32
    %c0_i32_0 = arith.constant 0 : i32
    %c0_i32_1 = arith.constant 0 : i32
    return %c0_i32, %c0_i32_0 : i32, i32
  }
  func.func @transform_6(%arg0: i32) -> (i32, i32) {
    %c0_i32 = arith.constant 0 : i32
    %c0_i32_0 = arith.constant 0 : i32
    %c0_i32_1 = arith.constant 0 : i32
    return %c0_i32, %c0_i32_0 : i32, i32
  }
  func.func @transform_7(%arg0: i32) -> (i32, i32) {
    %c0_i32 = arith.constant 0 : i32
    %c0_i32_0 = arith.constant 0 : i32
    %c0_i32_1 = arith.constant 0 : i32
    return %c0_i32, %c0_i32_0 : i32, i32
  }
  func.func @transform_8(%arg0: i32) -> (i32, i32) {
    %c0_i32 = arith.constant 0 : i32
    %c0_i32_0 = arith.constant 0 : i32
    %c0_i32_1 = arith.constant 0 : i32
    return %c0_i32, %c0_i32_0 : i32, i32
  }
  func.func @transform_9(%arg0: i32) -> (i32, i32) {
    %c0_i32 = arith.constant 0 : i32
    %c0_i32_0 = arith.constant 0 : i32
    return %arg0, %c0_i32 : i32, i32
  }
}

</mosaic_0001>

<bundles_post_ra>
// kernel: tpu_custom_call.1
= control target key start
LH: loop header
LB: loop body
LE: loop exit
PB: predicated region body
PF: predicated region fallthrough
CT: control target
= control target key end

     0   :  { %14 = vsyncpa [#allocation3], 0  ;;  %s954_s0 = inlined_call_operand.hbm [shape: bf16[8,32], index: 0, kind: input, shape index: {}]   ;;  %s955_s1 = inlined_call_operand.hbm [shape: bf16[32,128], index: 1, kind: input, shape index: {}]   ;;  %s956_s2 = inlined_call_operand.vmem [shape: f32[1,128], index: 2, kind: input, shape index: {}]   ;;  %s957_s3 = inlined_call_operand.hbm [shape: bf16[128,128], index: 3, kind: input, shape index: {}]   ;;  %s958_s4 = inlined_call_operand.vmem [shape: f32[1,128], index: 4, kind: input, shape index: {}]   ;;  %s959_s5 = inlined_call_operand.hbm [shape: bf16[128,128], index: 5, kind: input, shape index: {}]   ;;  %s960_s6 = inlined_call_operand.vmem [shape: f32[1,128], index: 6, kind: input, shape index: {}]   ;;  %s961_s7 = inlined_call_operand.hbm [shape: bf16[128,128], index: 7, kind: input, shape index: {}]   ;;  %s962_s8 = inlined_call_operand.vmem [shape: f32[1,128], index: 8, kind: input, shape index: {}]   ;;  %s963_s9 = inlined_call_operand.hbm [shape: f32[8,128], index: 9, kind: output, shape index: {}]  }
   0x1   :  { %15 = vsyncpa [#allocation6], 0 }
   0x2   :  { %16 = vsyncpa [#allocation9], 0 }
   0x3   :  { %17 = vsyncpa [#allocation4], 0  ;;  %s818_s30 = smov [#allocation5]  }
   0x4   :  { %s33_s10 = sshll.u32 %s818_s30, 4  ;;  %s34_s10 = int_to_ptr.vmem [resolvable:$true] %s33_s10 }
   0x5   :  { %s698_s11 = scalar_lea.vmem %s34_s10, 256  ;;  %p703_p1 = scmp.lt.s32.totalorder %s34_s10, %s34_s10 }
   0x6   :  { %p699_p0 = scmp.ne.s32.totalorder %s34_s10, %s698_s11  ;;  %p704_p2 = scmp.lt.s32.totalorder %s698_s11, %s698_s11 }
   0x8   :  { %p705_p3 = por %p704_p2, %p703_p1 }
   0xa   :  { %p706_p4 = pnand %p705_p3, %p699_p0 }
   0xc   :  { %709 = shalt.err (!%p706_p4)
}
   0xd   :  { %s819_s12 = smov 64   ;;  %s820_s13 = smov 4  }
   0xe   :  { %39 = dma.hbm_to_vmem [thread:$0]  %s955_s1, 256, %s34_s10, [#allocation6], %s819_s12, %s819_s12, %s820_s13  }
   0xf   :  { %s821_s16 = smov [#allocation8]   ;;  %s822_s18 = smov [#allocation2]  }
  0x10   :  { %s61_s17 = sshll.u32 %s821_s16, 4  ;;  %s24_s19 = sshll.u32 %s822_s18, 4  ;;  %s62_s17 = int_to_ptr.vmem [resolvable:$true] %s61_s17  ;;  %s25_s19 = int_to_ptr.vmem [resolvable:$true] %s24_s19 }
  0x11   :  { %s718_s20 = scalar_lea.vmem %s62_s17, 1024  ;;  %p723_p6 = scmp.lt.s32.totalorder %s62_s17, %s62_s17 }
  0x12   :  { %p719_p5 = scmp.ne.s32.totalorder %s62_s17, %s718_s20  ;;  %p724_p7 = scmp.lt.s32.totalorder %s718_s20, %s718_s20 }
  0x14   :  { %p725_p8 = por %p724_p7, %p723_p6 }
  0x16   :  { %p726_p9 = pnand %p725_p8, %p719_p5 }
  0x18   :  { %729 = shalt.err (!%p726_p9)
}
  0x19   :  { %67 = dma.hbm_to_vmem [thread:$0]  %s959_s5, 1024, %s62_s17, [#allocation9], %s819_s12, %s819_s12, %s820_s13  }
  0x1a   :  { %s738_s1 = scalar_lea.vmem %s25_s19, 64  ;;  %p743_p11 = scmp.lt.s32.totalorder %s25_s19, %s25_s19 }
  0x1b   :  { %p739_p10 = scmp.ne.s32.totalorder %s25_s19, %s738_s1  ;;  %p744_p12 = scmp.lt.s32.totalorder %s738_s1, %s738_s1 }
  0x1d   :  { %p745_p13 = por %p744_p12, %p743_p11 }
  0x1f   :  { %p746_p0 = pnand %p745_p13, %p739_p10 }
  0x21   :  { %749 = shalt.err (!%p746_p0)
}
  0x22   :  { %27 = dma.hbm_to_vmem [thread:$0]  %s954_s0, 64, %s25_s19, [#allocation3]  }
  0x23   :  { %s823_s25 = smov [#allocation7]   ;;  %s824_s27 = smov [#allocation10]  }
  0x24   :  { %s47_s26 = sshll.u32 %s823_s25, 4  ;;  %s75_s28 = sshll.u32 %s824_s27, 4  ;;  %s48_s26 = int_to_ptr.vmem [resolvable:$true] %s47_s26  ;;  %s76_s28 = int_to_ptr.vmem [resolvable:$true] %s75_s28 }
  0x25   :  { %s758_s29 = scalar_lea.vmem %s48_s26, 1024  ;;  %p763_p2 = scmp.lt.s32.totalorder %s48_s26, %s48_s26 }
  0x26   :  { %p759_p1 = scmp.ne.s32.totalorder %s48_s26, %s758_s29  ;;  %p764_p3 = scmp.lt.s32.totalorder %s758_s29, %s758_s29 }
  0x28   :  { %p765_p4 = por %p764_p3, %p763_p2 }
  0x2a   :  { %p766_p5 = pnand %p765_p4, %p759_p1 }
  0x2c   :  { %769 = shalt.err (!%p766_p5)
}
  0x2d   :  { %53 = dma.hbm_to_vmem [thread:$0]  %s957_s3, 1024, %s48_s26, [#allocation6], %s819_s12, %s819_s12, %s820_s13  }
  0x2e   :  { %s778_s0 = scalar_lea.vmem %s76_s28, 1024  ;;  %p783_p7 = scmp.lt.s32.totalorder %s76_s28, %s76_s28 }
  0x2f   :  { %p779_p6 = scmp.ne.s32.totalorder %s76_s28, %s778_s0  ;;  %p784_p8 = scmp.lt.s32.totalorder %s778_s0, %s778_s0 }
  0x31   :  { %p785_p9 = por %p784_p8, %p783_p7 }
  0x33   :  { %p786_p10 = pnand %p785_p9, %p779_p6 }
  0x35   :  { %789 = shalt.err (!%p786_p10)
}
  0x36   :  { %81 = dma.hbm_to_vmem [thread:$0]  %s961_s7, 1024, %s76_s28, [#allocation9], %s819_s12, %s819_s12, %s820_s13  }
  0x37   :  { %810 = dma.done.wait [#allocation3], 64  }
  0x38   :  { %811 = vsyncadd [#allocation3], 4294967232 }
  0x39   :  { %812 = dma.done.wait [#allocation6], 1280  }
  0x3a   :  { %813 = vsyncadd [#allocation6], 4294966016 }
  0x3b   :  { %814 = dma.done.wait [#allocation9], 2048  }
  0x3c   :  { %815 = vsyncadd [#allocation9], 4294965248  ;;  %v825_v0 = vmov 0.0   ;;  %vm826_vm0 = vmmov 0   ;;  %v664_v1 = vld [vmem:[#allocation5 + $0x8] sm:$0xff]   ;;  %v665_v2 = vld [vmem:[#allocation5] sm:$0xff]  }
  0x3d   :  { %586 = vmatprep.subr.bf16.mxu0 %v825_v0  ;;  %590 = vmatprep.mubr.msk.bf16.mxu0 %vm826_vm0, %v825_v0  ;;  %v666_v3 = vld [vmem:[#allocation7 + $0x38] sm:$0xff]   ;;  %vm124_vm1 = vcmask 261120   ;;  %v667_v4 = vld [vmem:[#allocation7 + $0x30] sm:$0xff]   ;;  %v100_v5 = vld [vmem:[#allocation2] sm:$0xf]  ;;  %s827_s16 = smov [#allocation11]  }
  0x3e   :  { %594 = vmatprep.subr.bf16.mxu1 %v825_v0  ;;  %610 = vmatprep.mubr.msk.bf16.mxu1 %vm826_vm0, %v825_v0  ;;  %v668_v6 = vld [vmem:[#allocation7 + $0x28] sm:$0xff]   ;;  %v669_v7 = vld [vmem:[#allocation7 + $0x20] sm:$0xff]   ;;  %v670_v8 = vld [vmem:[#allocation7 + $0x18] sm:$0xff]   ;;  %s514_s17 = sshll.u32 %s827_s16, 4  ;;  %s515_s17 = int_to_ptr.vmem [resolvable:$true] %s514_s17 }
  0x3f   :  { %587 = vmatpush3.bf16.msra.mxu0 %v664_v1  ;;  %595 = vmatpush3.bf16.msra.mxu1 %v666_v3  ;;  %v671_v9 = vld [vmem:[#allocation7 + $0x10] sm:$0xff]   ;;  %v672_v10 = vld [vmem:[#allocation7 + $0x8] sm:$0xff]   ;;  %v673_v11 = vld [vmem:[#allocation7] sm:$0xff]   ;;  %p795_p12 = scmp.lt.s32.totalorder %s515_s17, %s515_s17 }
  0x40   :  { %588 = vmatprep.subr.bf16.mxu0 %v825_v0  ;;  %596 = vmatprep.subr.bf16.mxu1 %v825_v0  ;;  %v674_v12 = vld [vmem:[#allocation8 + $0x38] sm:$0xff]   ;;  %v675_v13 = vld [vmem:[#allocation8 + $0x30] sm:$0xff]   ;;  %v676_v14 = vld [vmem:[#allocation8 + $0x28] sm:$0xff]  }
  0x41   :  { %v677_v15 = vld [vmem:[#allocation8 + $0x20] sm:$0xff]   ;;  %v678_v16 = vld [vmem:[#allocation8 + $0x18] sm:$0xff]   ;;  %v679_v17 = vld [vmem:[#allocation8 + $0x10] sm:$0xff]  }
  0x42   :  { %v525_v18 = vld [vmem:[%s956_s2] ss:$0 sm:$0xff]  ;;  %v681_v27 = vld [vmem:[#allocation8] sm:$0xff]   ;;  %v682_v28 = vld [vmem:[#allocation10 + $0x38] sm:$0xff]  }
  0x43   :  { %589 = vmatpush3.bf16.msra.mxu0 %v665_v2  ;;  %597 = vmatpush3.bf16.msra.mxu1 %v667_v4  ;;  %v680_v26 = vld [vmem:[#allocation8 + $0x8] sm:$0xff]   ;;  %v683_v29 = vld [vmem:[#allocation10 + $0x30] sm:$0xff]   ;;  %v685_v31 = vld [vmem:[#allocation10 + $0x20] sm:$0xff]  }
  0x44   :  { %614 = vmatprep.subr.bf16.mxu0 %v825_v0  ;;  %598 = vmatprep.subr.bf16.mxu1 %v825_v0  ;;  %v684_v30 = vld [vmem:[#allocation10 + $0x28] sm:$0xff]   ;;  %v686_v32 = vld [vmem:[#allocation10 + $0x18] sm:$0xff]   ;;  %v687_v33 = vld [vmem:[#allocation10 + $0x10] sm:$0xff]  }
  0x45   :  { %v529_v34 = vld [vmem:[%s958_s4] ss:$0 sm:$0xff]  ;;  %v689_v43 = vld [vmem:[#allocation10] sm:$0xff]  }
  0x46   :  { %591 = vmatmul.mubr.msk.bf16.vlgmr.msra.gmra.mxu0 %vm124_vm1, %v100_v5  ;;  %v688_v42 = vld [vmem:[#allocation10 + $0x8] sm:$0xff]  }
  0x47   :  { %630 = vmatprep.mubr.msk.bf16.mxu0 %vm826_vm0, %v825_v0  ;;  %599 = vmatpush3.bf16.msra.mxu1 %v668_v6  ;;  %v538_v44 = vld [vmem:[%s960_s6] ss:$0 sm:$0xff]  ;;  %s790_s6 = scalar_lea.vmem %s515_s17, 128 }
  0x48   :  { %600 = vmatprep.subr.bf16.mxu1 %v825_v0  ;;  %615 = vmatpush3.bf16.msra.mxu0 %v674_v12  ;;  %v547_v52 = vld [vmem:[%s962_s8] ss:$0 sm:$0xff]  ;;  %p791_p11 = scmp.ne.s32.totalorder %s515_s17, %s790_s6  ;;  %p796_p13 = scmp.lt.s32.totalorder %s790_s6, %s790_s6 }
  0x49   :  { %616 = vmatprep.subr.bf16.mxu0 %v825_v0 }
  0x4a   :  { %p797_p0 = por %p796_p13, %p795_p12 }
  0x4b   :  { %601 = vmatpush3.bf16.msra.mxu1 %v669_v7 }
  0x4c   :  { %602 = vmatprep.subr.bf16.mxu1 %v825_v0  ;;  %617 = vmatpush3.bf16.msra.mxu0 %v675_v13  ;;  %p798_p1 = pnand %p797_p0, %p791_p11 }
  0x4d   :  { %618 = vmatprep.subr.bf16.mxu0 %v825_v0 }
  0x4f   :  { %603 = vmatpush3.bf16.msra.mxu1 %v670_v8 }
  0x50   :  { %604 = vmatprep.subr.bf16.mxu1 %v825_v0  ;;  %619 = vmatpush3.bf16.msra.mxu0 %v676_v14 }
  0x51   :  { %620 = vmatprep.subr.bf16.mxu0 %v825_v0 }
  0x53   :  { %605 = vmatpush3.bf16.msra.mxu1 %v671_v9 }
  0x54   :  { %606 = vmatprep.subr.bf16.mxu1 %v825_v0  ;;  %621 = vmatpush3.bf16.msra.mxu0 %v677_v15 }
  0x55   :  { %622 = vmatprep.subr.bf16.mxu0 %v825_v0 }
  0x57   :  { %607 = vmatpush3.bf16.msra.mxu1 %v672_v10 }
  0x58   :  { %608 = vmatprep.subr.bf16.mxu1 %v825_v0  ;;  %623 = vmatpush3.bf16.msra.mxu0 %v678_v16 }
  0x59   :  { %624 = vmatprep.subr.bf16.mxu0 %v825_v0 }
  0x5b   :  { %609 = vmatpush3.bf16.msra.mxu1 %v673_v11 }
  0x5c   :  { %634 = vmatprep.subr.bf16.mxu1 %v825_v0  ;;  %625 = vmatpush3.bf16.msra.mxu0 %v679_v17 }
  0x5d   :  { %626 = vmatprep.subr.bf16.mxu0 %v825_v0 }
  0x60   :  { %627 = vmatpush3.bf16.msra.mxu0 %v680_v26 }
  0x61   :  { %628 = vmatprep.subr.bf16.mxu0 %v825_v0 }
  0x64   :  { %629 = vmatpush3.bf16.msra.mxu0 %v681_v27 }
 0x106   :  { %v162_v19 = vpop.f32.mrf.mxu0 }
 0x107   :  { %v163_v20 = vadd.f32 %v525_v18, %v162_v19 }
 0x108   :  { %v592_v21 = vpop.f32.mrf.mxu0 }
 0x109   :  { %v168_v22 = vmax.f32 %v163_v20, 0.0 }
 0x10a   :  { %v165_v23 = vpop.f32.mrf.mxu0 }
 0x10b   :  { %v169_v24 = vpack.c.bf16 %v168_v22, %v168_v22 }
 0x10c   :  { %v593_v25 = vpop.f32.mrf.mxu0 }
 0x10d   :  { %611 = vmatmul.mubr.bf16.vlgmr.msra.gmra.mxu1 %v169_v24 }
 0x10e   :  { %650 = vmatprep.mubr.msk.bf16.mxu1 %vm826_vm0, %v825_v0  ;;  %635 = vmatpush3.bf16.msra.mxu1 %v682_v28 }
 0x10f   :  { %636 = vmatprep.subr.bf16.mxu1 %v825_v0 }
 0x112   :  { %637 = vmatpush3.bf16.msra.mxu1 %v683_v29 }
 0x113   :  { %638 = vmatprep.subr.bf16.mxu1 %v825_v0 }
 0x116   :  { %639 = vmatpush3.bf16.msra.mxu1 %v684_v30 }
 0x117   :  { %640 = vmatprep.subr.bf16.mxu1 %v825_v0 }
 0x11a   :  { %641 = vmatpush3.bf16.msra.mxu1 %v685_v31 }
 0x11b   :  { %642 = vmatprep.subr.bf16.mxu1 %v825_v0 }
 0x11e   :  { %643 = vmatpush3.bf16.msra.mxu1 %v686_v32 }
 0x11f   :  { %644 = vmatprep.subr.bf16.mxu1 %v825_v0 }
 0x122   :  { %645 = vmatpush3.bf16.msra.mxu1 %v687_v33 }
 0x123   :  { %646 = vmatprep.subr.bf16.mxu1 %v825_v0 }
 0x126   :  { %647 = vmatpush3.bf16.msra.mxu1 %v688_v42 }
 0x127   :  { %648 = vmatprep.subr.bf16.mxu1 %v825_v0 }
 0x12a   :  { %649 = vmatpush3.bf16.msra.mxu1 %v689_v43 }
 0x1cd   :  { %v275_v35 = vpop.f32.mrf.mxu1 }
 0x1ce   :  { %v276_v36 = vadd.f32 %v529_v34, %v275_v35 }
 0x1cf   :  { %v612_v37 = vpop.f32.mrf.mxu1 }
 0x1d0   :  { %v281_v38 = vmax.f32 %v276_v36, 0.0 }
 0x1d1   :  { %v278_v39 = vpop.f32.mrf.mxu1 }
 0x1d2   :  { %v282_v40 = vpack.c.bf16 %v281_v38, %v281_v38 }
 0x1d3   :  { %v613_v41 = vpop.f32.mrf.mxu1 }
 0x1d4   :  { %631 = vmatmul.mubr.bf16.vlgmr.msra.gmra.mxu0 %v282_v40 }
 0x294   :  { %v388_v45 = vpop.f32.mrf.mxu0 }
 0x295   :  { %v389_v46 = vadd.f32 %v538_v44, %v388_v45 }
 0x296   :  { %v632_v47 = vpop.f32.mrf.mxu0 }
 0x297   :  { %v394_v48 = vmax.f32 %v389_v46, 0.0 }
 0x298   :  { %v391_v49 = vpop.f32.mrf.mxu0 }
 0x299   :  { %v395_v50 = vpack.c.bf16 %v394_v48, %v394_v48 }
 0x29a   :  { %v633_v51 = vpop.f32.mrf.mxu0 }
 0x29b   :  { %651 = vmatmul.mubr.bf16.vlgmr.msra.gmra.mxu1 %v395_v50 }
 0x35b   :  { %v501_v53 = vpop.f32.mrf.mxu1 }
 0x35c   :  { %v502_v54 = vadd.f32 %v547_v52, %v501_v53 }
 0x35d   :  { %v652_v55 = vpop.f32.mrf.mxu1 }
 0x35e   :  { %507 = vst [vmem:[#allocation11] sm:$0xff] %v502_v54 }
 0x35f   :  { %v504_v56 = vpop.f32.mrf.mxu1 }
 0x360   :  { %801 = shalt.err (!%p798_p1)
}
 0x361   :  { %517 = dma.vmem_to_hbm [thread:$0]  %s515_s17, 128, %s963_s9, [#allocation4]   ;;  %v653_v57 = vpop.f32.mrf.mxu1 }
 0x362   :  { %816 = dma.done.wait [#allocation4], 128  }
 0x363   :  { %817 = vsyncadd [#allocation4], 4294967168 }
 0x364   :  { %521 = vsyncpa [#allocation3], 1 }
 0x365   :  { %522 = vsyncpa [#allocation6], 1 }
 0x366   :  { %523 = vsyncpa [#allocation9], 1 }
 0x367   :  { %524 = vsyncpa [#allocation4], 1 }

</bundles_post_ra>
